<compile_context>
chip_gen: v7x
topology: tpu7x:2x2x1
jax: 0.10.0
libtpu: 0.0.40
codegen_flags: <defaults>
</compile_context>

<pallas_src>
import functools
import math

import jax
import jax.numpy as jnp
from jax.experimental import pallas as pl
from jax.experimental.pallas import tpu as pltpu


def _round_up(x, m):
    return (x + m - 1) // m * m


# ----------------------------- Pallas kernel --------------------------------

def _ff_kernel(x_ref, gf_ref, w1a_ref, w1b_ref, b1_ref, w2_ref, b2_ref,
               w3t_ref, b3_ref, o_ref):
    # x_ref:   (TM, input_dim) bf16     gf_ref: (TM, gfd) bf16
    # w1a_ref: (input_dim, H)  bf16     w1b_ref:(gfd, H)  bf16   b1_ref:(1, H) f32
    # w2_ref:  (H, H)          bf16     b2_ref: (1, H)    f32
    # w3t_ref: (d_out, H)      bf16     b3_ref: (d_out,1) f32
    # o_ref:   (d_out, TM)     f32   (transposed: node dim in lanes -> dense vst)

    # Layer 1: [x | gf] @ W1 + b1 as a split-K pair of bf16 MXU matmuls with
    # f32 accumulation (the concat is never materialized in HBM).
    h1 = jnp.dot(x_ref[...], w1a_ref[...], preferred_element_type=jnp.float32)
    h1 = h1 + jnp.dot(gf_ref[...], w1b_ref[...],
                      preferred_element_type=jnp.float32)
    h1 = jnp.maximum(h1 + b1_ref[...], 0.0)            # f32 bias/ReLU

    # Layer 2.
    h2 = jnp.dot(h1.astype(jnp.bfloat16), w2_ref[...],
                 preferred_element_type=jnp.float32) + b2_ref[...]
    h2 = jnp.maximum(h2, 0.0)

    # Layer 3 computed transposed (d_out x TM): the tiny output dim sits on
    # sublanes and the node dim fills the lanes -> lane-dense unmasked stores.
    out_t = jnp.einsum('oh,nh->on', w3t_ref[...], h2.astype(jnp.bfloat16),
                       preferred_element_type=jnp.float32)
    o_ref[...] = (out_t + b3_ref[...]).astype(o_ref.dtype)


def ff_forward_pallas(x, gf, w1a, w1b, b1, w2, b2, w3t, b3, *, tm=512):
    """3-layer MLP on node rows.

    x:   [N, input_dim]  gf: [N, gfd]   (both cast to bf16 here)
    Returns [N, d_out] float32.
    """
    n, d_in = x.shape
    gfd = gf.shape[1]
    h = w1a.shape[1]
    d_out = w3t.shape[0]

    # Large row tiles amortize the ~0.35us per-grid-step overhead; keep the
    # tile (and padded N) a multiple of 128 so the transposed output stays
    # lane-dense.  Pad N instead of asserting divisibility.
    tm_eff = tm if n >= tm else _round_up(n, 128)
    n_pad = _round_up(n, tm_eff)

    xb = x.astype(jnp.bfloat16)
    gb = gf.astype(jnp.bfloat16)
    if n_pad != n:
        xb = jnp.pad(xb, ((0, n_pad - n), (0, 0)))
        gb = jnp.pad(gb, ((0, n_pad - n), (0, 0)))

    grid = (n_pad // tm_eff,)
    full = lambda i: (0, 0)   # weights/biases: whole-array block, resident

    out_t = pl.pallas_call(
        _ff_kernel,
        out_shape=jax.ShapeDtypeStruct((d_out, n_pad), jnp.float32),
        grid_spec=pltpu.PrefetchScalarGridSpec(
            num_scalar_prefetch=0,
            grid=grid,
            in_specs=[
                pl.BlockSpec((tm_eff, d_in), lambda i: (i, 0)),
                pl.BlockSpec((tm_eff, gfd), lambda i: (i, 0)),
                pl.BlockSpec((d_in, h), full),
                pl.BlockSpec((gfd, h), full),
                pl.BlockSpec((1, h), full),
                pl.BlockSpec((h, h), full),
                pl.BlockSpec((1, h), full),
                pl.BlockSpec((d_out, h), full),
                pl.BlockSpec((d_out, 1), full),
            ],
            out_specs=pl.BlockSpec((d_out, tm_eff), lambda i: (0, i)),
        ),
        compiler_params=pltpu.CompilerParams(
            dimension_semantics=("parallel",)),
    )(xb, gb, w1a.astype(jnp.bfloat16), w1b.astype(jnp.bfloat16), b1,
      w2.astype(jnp.bfloat16), b2, w3t.astype(jnp.bfloat16), b3)

    return out_t[:, :n].T        # back to [N, d_out]


# --------------------------- module-level wrapper ----------------------------

def _broadcast_graph_features(graph_features, num_graphs, gfd, num_nodes, n):
    """Exact replication of the torch broadcast dance; returns [N, gfd]."""
    gf = graph_features.T                              # .T            [gfd, G]
    gf = jnp.expand_dims(gf, axis=gfd)                 # .unsqueeze(gfd)
    gf = jnp.tile(gf, (1, 1, num_nodes))               # .repeat(1,1,num_nodes)
    gf = gf.reshape(num_graphs, gfd, num_nodes)        # .view(G, gfd, nodes)
    gf = jnp.transpose(gf, (1, 0, 2)).reshape(gfd, n)  # cat(unbind(0), dim=1)
    return gf.T                                        # what hstack appends


def obm_ff_invariant_forward(x, graph_features, params, *, num_graphs,
                             graph_feature_dim, classify=False, tm=512):
    """Reproduces OBM_ff_invariant.forward (head='regression' -> classify=False).

    x:              [N, input_dim]         N = num_graphs * num_nodes
    graph_features: [num_graphs, graph_feature_dim]
    params:         (w1, b1, w2, b2, w3, b3); weights stored [in, out]
                    (transpose of nn.Linear.weight), biases [1, out].
    """
    n = x.shape[0]
    num_nodes = n // num_graphs
    gfd = graph_feature_dim
    w1, b1, w2, b2, w3, b3 = params

    if gfd <= 0:
        # TODO(synk): graph_feature_dim == 0 path (raw hstack of graph_features.T).
        raise NotImplementedError("graph_feature_dim == 0 not implemented")

    gf_nodes = _broadcast_graph_features(graph_features, num_graphs, gfd,
                                         num_nodes, n)

    input_dim = w1.shape[0] - gfd
    w1a, w1b = w1[:input_dim], w1[input_dim:]          # split-K layer 1
    d_out = w3.shape[1]
    w3t = w3.T                                         # [d_out, H]
    b3t = b3.reshape(d_out, 1)

    out = ff_forward_pallas(x, gf_nodes, w1a, w1b, b1, w2, b2, w3t, b3t, tm=tm)

    if classify:
        out = out.reshape(num_graphs, num_nodes, -1)[:, -1, :]
    return out


# ------------------------------- reference ----------------------------------

def _ref_forward(x, graph_features, params, num_graphs, gfd):
    """Pure-JAX reference mirroring the kernel math (bf16 operands, f32 acc)."""
    w1, b1, w2, b2, w3, b3 = params
    n = x.shape[0]
    num_nodes = n // num_graphs
    gf_nodes = _broadcast_graph_features(graph_features, num_graphs, gfd,
                                         num_nodes, n)
    input_dim = w1.shape[0] - gfd
    xb = x.astype(jnp.bfloat16)
    gb = gf_nodes.astype(jnp.bfloat16)
    w1a = w1[:input_dim].astype(jnp.bfloat16)
    w1b = w1[input_dim:].astype(jnp.bfloat16)
    h1 = jnp.maximum(
        jnp.dot(xb, w1a, preferred_element_type=jnp.float32)
        + jnp.dot(gb, w1b, preferred_element_type=jnp.float32) + b1, 0.0)
    h2 = jnp.maximum(
        jnp.dot(h1.astype(jnp.bfloat16), w2.astype(jnp.bfloat16),
                preferred_element_type=jnp.float32) + b2, 0.0)
    return jnp.dot(h2.astype(jnp.bfloat16), w3.astype(jnp.bfloat16),
                   preferred_element_type=jnp.float32) + b3


def _linear_init(key, fan_in, fan_out, dtype=jnp.float32):
    """Kaiming-uniform-ish init; weight returned as [in, out]."""
    kw, kb = jax.random.split(key)
    bound = 1.0 / math.sqrt(fan_in)
    w = jax.random.uniform(kw, (fan_in, fan_out), dtype, -bound, bound)
    b = jax.random.uniform(kb, (1, fan_out), dtype, -bound, bound)
    return w, b


# ---------------------------------- main -------------------------------------

if __name__ == "__main__":
    node_feature_dim = 6
    graph_feature_dim = 2
    hidden_dim = 32
    output_dim = 1

    key = jax.random.PRNGKey(0)
    k1, k2, k3, kdata = jax.random.split(key, 4)

    d_in = node_feature_dim + graph_feature_dim
    w1, b1 = _linear_init(k1, d_in, hidden_dim)
    w2, b2 = _linear_init(k2, hidden_dim, hidden_dim)
    w3, b3 = _linear_init(k3, hidden_dim, output_dim)
    params = (w1, b1, w2, b2, w3, b3)

    # --- test 1: tiny batch (2 graphs x 8 nodes), single tile + padding ------
    num_graphs, num_nodes = 2, 8
    N = num_graphs * num_nodes
    kx, kg, kdata = jax.random.split(kdata, 3)
    x = jax.random.normal(kx, (N, node_feature_dim), jnp.float32)
    graph_features = jax.random.normal(kg, (num_graphs, graph_feature_dim),
                                       jnp.float32)

    fwd = jax.jit(functools.partial(
        obm_ff_invariant_forward, num_graphs=num_graphs,
        graph_feature_dim=graph_feature_dim, classify=False))
    out = jax.block_until_ready(fwd(x, graph_features, params))
    ref = _ref_forward(x, graph_features, params, num_graphs, graph_feature_dim)
    assert out.shape == (N, output_dim), out.shape
    assert jnp.allclose(out, ref, atol=1e-3, rtol=1e-3), "mismatch (test 1)"

    # --- test 2: multi-tile grid with a ragged tail (45 graphs x 8 nodes) ----
    num_graphs2, num_nodes2 = 45, 8
    N2 = num_graphs2 * num_nodes2            # 360 -> pads to 384, 3 grid steps
    kx2, kg2 = jax.random.split(kdata)
    x2 = jax.random.normal(kx2, (N2, node_feature_dim), jnp.float32)
    gfeat2 = jax.random.normal(kg2, (num_graphs2, graph_feature_dim),
                               jnp.float32)
    fwd2 = jax.jit(functools.partial(
        obm_ff_invariant_forward, num_graphs=num_graphs2,
        graph_feature_dim=graph_feature_dim, classify=False, tm=128))
    out2 = jax.block_until_ready(fwd2(x2, gfeat2, params))
    ref2 = _ref_forward(x2, gfeat2, params, num_graphs2, graph_feature_dim)
    assert out2.shape == (N2, output_dim), out2.shape
    assert jnp.allclose(out2, ref2, atol=1e-3, rtol=1e-3), "mismatch (test 2)"

    print("KERNEL_OK")
</pallas_src>

<mosaic_0001>
module attributes {stable_mosaic.version = 11 : i64} {
  func.func @_ff_kernel(%arg0: i32, %arg1: memref<128x6xbf16, #tpu.memory_space<vmem>>, %arg2: memref<128x2xbf16, #tpu.memory_space<vmem>>, %arg3: memref<6x32xbf16, #tpu.memory_space<vmem>>, %arg4: memref<2x32xbf16, #tpu.memory_space<vmem>>, %arg5: memref<1x32xf32, #tpu.memory_space<vmem>>, %arg6: memref<32x32xbf16, #tpu.memory_space<vmem>>, %arg7: memref<1x32xf32, #tpu.memory_space<vmem>>, %arg8: memref<1x32xbf16, #tpu.memory_space<vmem>>, %arg9: memref<1x1xf32, #tpu.memory_space<vmem>>, %arg10: memref<1x128xf32, #tpu.memory_space<vmem>>) attributes {dimension_semantics = [#tpu.dimension_semantics<parallel>], iteration_bounds = array<i64: 1>, scalar_prefetch = 0 : i64, scratch_operands = 0 : i64, tpu.core_type = #tpu.core_type<tc>, window_params = [{transform_indices = @transform_0, window_bounds = array<i64: 128, 6>}, {transform_indices = @transform_1, window_bounds = array<i64: 128, 2>}, {pipeline_mode = #tpu.pipeline_mode<synchronous>, transform_indices = @transform_2, window_bounds = array<i64: 6, 32>}, {pipeline_mode = #tpu.pipeline_mode<synchronous>, transform_indices = @transform_3, window_bounds = array<i64: 2, 32>}, {pipeline_mode = #tpu.pipeline_mode<synchronous>, transform_indices = @transform_4, window_bounds = array<i64: 1, 32>}, {pipeline_mode = #tpu.pipeline_mode<synchronous>, transform_indices = @transform_5, window_bounds = array<i64: 32, 32>}, {pipeline_mode = #tpu.pipeline_mode<synchronous>, transform_indices = @transform_6, window_bounds = array<i64: 1, 32>}, {pipeline_mode = #tpu.pipeline_mode<synchronous>, transform_indices = @transform_7, window_bounds = array<i64: 1, 32>}, {pipeline_mode = #tpu.pipeline_mode<synchronous>, transform_indices = @transform_8, window_bounds = array<i64: 1, 1>}, {transform_indices = @transform_9, window_bounds = array<i64: 1, 128>}]} {
    %c0 = arith.constant 0 : index
    %c0_0 = arith.constant 0 : index
    %0 = vector.load %arg1[%c0, %c0_0] : memref<128x6xbf16, #tpu.memory_space<vmem>>, vector<128x6xbf16>
    %c0_1 = arith.constant 0 : index
    %c0_2 = arith.constant 0 : index
    %1 = vector.load %arg3[%c0_1, %c0_2] : memref<6x32xbf16, #tpu.memory_space<vmem>>, vector<6x32xbf16>
    %cst = arith.constant dense<0.000000e+00> : vector<128x32xf32>
    %2 = tpu.matmul %0, %1, %cst {dimension_numbers = #tpu.dot_dimension_numbers<[1], [0], [0], [1], [0, 0, 1, 1], [], []>} : vector<128x6xbf16>, vector<6x32xbf16>, vector<128x32xf32> -> vector<128x32xf32>
    %c0_3 = arith.constant 0 : index
    %c0_4 = arith.constant 0 : index
    %3 = vector.load %arg2[%c0_3, %c0_4] : memref<128x2xbf16, #tpu.memory_space<vmem>>, vector<128x2xbf16>
    %c0_5 = arith.constant 0 : index
    %c0_6 = arith.constant 0 : index
    %4 = vector.load %arg4[%c0_5, %c0_6] : memref<2x32xbf16, #tpu.memory_space<vmem>>, vector<2x32xbf16>
    %cst_7 = arith.constant dense<0.000000e+00> : vector<128x32xf32>
    %5 = tpu.matmul %3, %4, %cst_7 {dimension_numbers = #tpu.dot_dimension_numbers<[1], [0], [0], [1], [0, 0, 1, 1], [], []>} : vector<128x2xbf16>, vector<2x32xbf16>, vector<128x32xf32> -> vector<128x32xf32>
    %6 = arith.addf %2, %5 : vector<128x32xf32>
    %c0_8 = arith.constant 0 : index
    %c0_9 = arith.constant 0 : index
    %7 = vector.load %arg5[%c0_8, %c0_9] : memref<1x32xf32, #tpu.memory_space<vmem>>, vector<1x32xf32>
    %8 = vector.broadcast %7 : vector<1x32xf32> to vector<128x32xf32>
    %9 = arith.addf %6, %8 : vector<128x32xf32>
    %cst_10 = arith.constant 0.000000e+00 : f32
    %10 = vector.broadcast %cst_10 : f32 to vector<128x32xf32>
    %11 = arith.maximumf %9, %10 : vector<128x32xf32>
    %12 = arith.truncf %11 : vector<128x32xf32> to vector<128x32xbf16>
    %c0_11 = arith.constant 0 : index
    %c0_12 = arith.constant 0 : index
    %13 = vector.load %arg6[%c0_11, %c0_12] : memref<32x32xbf16, #tpu.memory_space<vmem>>, vector<32x32xbf16>
    %cst_13 = arith.constant dense<0.000000e+00> : vector<128x32xf32>
    %14 = tpu.matmul %12, %13, %cst_13 {dimension_numbers = #tpu.dot_dimension_numbers<[1], [0], [0], [1], [0, 0, 1, 1], [], []>} : vector<128x32xbf16>, vector<32x32xbf16>, vector<128x32xf32> -> vector<128x32xf32>
    %c0_14 = arith.constant 0 : index
    %c0_15 = arith.constant 0 : index
    %15 = vector.load %arg7[%c0_14, %c0_15] : memref<1x32xf32, #tpu.memory_space<vmem>>, vector<1x32xf32>
    %16 = vector.broadcast %15 : vector<1x32xf32> to vector<128x32xf32>
    %17 = arith.addf %14, %16 : vector<128x32xf32>
    %cst_16 = arith.constant 0.000000e+00 : f32
    %18 = vector.broadcast %cst_16 : f32 to vector<128x32xf32>
    %19 = arith.maximumf %17, %18 : vector<128x32xf32>
    %c0_17 = arith.constant 0 : index
    %c0_18 = arith.constant 0 : index
    %20 = vector.load %arg8[%c0_17, %c0_18] : memref<1x32xbf16, #tpu.memory_space<vmem>>, vector<1x32xbf16>
    %21 = arith.truncf %19 : vector<128x32xf32> to vector<128x32xbf16>
    "tpu.trace_start"() <{level = 10 : i32, message = "oh,nh->on"}> : () -> ()
    %cst_19 = arith.constant dense<0.000000e+00> : vector<1x128xf32>
    %22 = tpu.matmul %20, %21, %cst_19 {dimension_numbers = #tpu.dot_dimension_numbers<[1], [1], [0], [0], [0, 0, 1, 0], [], []>} : vector<1x32xbf16>, vector<128x32xbf16>, vector<1x128xf32> -> vector<1x128xf32>
    "tpu.trace_stop"() : () -> ()
    %c0_20 = arith.constant 0 : index
    %c0_21 = arith.constant 0 : index
    %23 = vector.load %arg9[%c0_20, %c0_21] : memref<1x1xf32, #tpu.memory_space<vmem>>, vector<1x1xf32>
    %24 = vector.broadcast %23 : vector<1x1xf32> to vector<1x128xf32>
    %25 = arith.addf %22, %24 : vector<1x128xf32>
    %c0_22 = arith.constant 0 : index
    %c0_23 = arith.constant 0 : index
    %26 = vector.load %arg10[%c0_22, %c0_23] : memref<1x128xf32, #tpu.memory_space<vmem>>, vector<1x128xf32>
    tpu.vector_store %arg10[%c0_22, %c0_23], %25 {strides = array<i32>} : memref<1x128xf32, #tpu.memory_space<vmem>>, vector<1x128xf32>,
    return
  }
  func.func @transform_0(%arg0: i32) -> (i32, i32) {
    %c0_i32 = arith.constant 0 : i32
    %c0_i32_0 = arith.constant 0 : i32
    return %arg0, %c0_i32 : i32, i32
  }
  func.func @transform_1(%arg0: i32) -> (i32, i32) {
    %c0_i32 = arith.constant 0 : i32
    %c0_i32_0 = arith.constant 0 : i32
    return %arg0, %c0_i32 : i32, i32
  }
  func.func @transform_2(%arg0: i32) -> (i32, i32) {
    %c0_i32 = arith.constant 0 : i32
    %c0_i32_0 = arith.constant 0 : i32
    %c0_i32_1 = arith.constant 0 : i32
    return %c0_i32, %c0_i32_0 : i32, i32
  }
  func.func @transform_3(%arg0: i32) -> (i32, i32) {
    %c0_i32 = arith.constant 0 : i32
    %c0_i32_0 = arith.constant 0 : i32
    %c0_i32_1 = arith.constant 0 : i32
    return %c0_i32, %c0_i32_0 : i32, i32
  }
  func.func @transform_4(%arg0: i32) -> (i32, i32) {
    %c0_i32 = arith.constant 0 : i32
    %c0_i32_0 = arith.constant 0 : i32
    %c0_i32_1 = arith.constant 0 : i32
    return %c0_i32, %c0_i32_0 : i32, i32
  }
  func.func @transform_5(%arg0: i32) -> (i32, i32) {
    %c0_i32 = arith.constant 0 : i32
    %c0_i32_0 = arith.constant 0 : i32
    %c0_i32_1 = arith.constant 0 : i32
    return %c0_i32, %c0_i32_0 : i32, i32
  }
  func.func @transform_6(%arg0: i32) -> (i32, i32) {
    %c0_i32 = arith.constant 0 : i32
    %c0_i32_0 = arith.constant 0 : i32
    %c0_i32_1 = arith.constant 0 : i32
    return %c0_i32, %c0_i32_0 : i32, i32
  }
  func.func @transform_7(%arg0: i32) -> (i32, i32) {
    %c0_i32 = arith.constant 0 : i32
    %c0_i32_0 = arith.constant 0 : i32
    %c0_i32_1 = arith.constant 0 : i32
    return %c0_i32, %c0_i32_0 : i32, i32
  }
  func.func @transform_8(%arg0: i32) -> (i32, i32) {
    %c0_i32 = arith.constant 0 : i32
    %c0_i32_0 = arith.constant 0 : i32
    %c0_i32_1 = arith.constant 0 : i32
    return %c0_i32, %c0_i32_0 : i32, i32
  }
  func.func @transform_9(%arg0: i32) -> (i32, i32) {
    %c0_i32 = arith.constant 0 : i32
    %c0_i32_0 = arith.constant 0 : i32
    return %c0_i32, %arg0 : i32, i32
  }
}

</mosaic_0001>

<bundles_post_ra>
// kernel: obm_ff_invariant_forward.1
= control target key start
LH: loop header
LB: loop body
LE: loop exit
PB: predicated region body
PF: predicated region fallthrough
CT: control target
= control target key end

     0   :  { %vm134_vm0 = vcmask 1040384   ;;  %vm109_vm1 = vcmask 15360   ;;  %vm300_vm2 = vcmask 1042432   ;;  %vm275_vm3 = vcmask 48128   ;;  %s1068_s3 = inlined_call_operand.vmem [shape: bf16[2,32], index: 3, kind: input, shape index: {}]   ;;  %s1069_s1 = inlined_call_operand.vmem [shape: bf16[128,2], index: 1, kind: input, shape index: {}]   ;;  %s1070_s2 = inlined_call_operand.vmem [shape: bf16[6,32], index: 2, kind: input, shape index: {}]   ;;  %s1071_s0 = inlined_call_operand.vmem [shape: bf16[128,6], index: 0, kind: input, shape index: {}]   ;;  %s1072_s5 = inlined_call_operand.vmem [shape: bf16[32,32], index: 5, kind: input, shape index: {}]   ;;  %s1073_s4 = inlined_call_operand.vmem [shape: f32[1,32], index: 4, kind: input, shape index: {}]   ;;  %s1074_s8 = inlined_call_operand.<no memory space> [shape: f32[1,1], index: 8, kind: input, shape index: {}]   ;;  %s1075_s6 = inlined_call_operand.vmem [shape: f32[1,32], index: 6, kind: input, shape index: {}]   ;;  %s1076_s7 = inlined_call_operand.vmem [shape: bf16[1,32], index: 7, kind: input, shape index: {}]   ;;  %s1077_s9 = inlined_call_operand.vmem [shape: f32[1,128], index: 9, kind: output, shape index: {}]  }
   0x1   :  { %v68_v0 = vld [vmem:[%s1068_s3] sm:$0x1]  ;;  %v881_v3 = vld [vmem:[%s1069_s1 + $0x8] sm:$0xff]   ;;  %v882_v6 = vld [vmem:[%s1069_s1 + $0x10] sm:$0xff]   ;;  %vm471_vm4 = vcmask 261120   ;;  %vm899_vm5 = vmmov 0  }
   0x2   :  { %874 = vmatprep.subr.msk.bf16.mxu0 %vm134_vm0, %v68_v0  ;;  %v136_v1 = vsel %vm134_vm0, %v68_v0, 0  ;;  %v880_v2 = vld [vmem:[%s1069_s1] sm:$0xff]   ;;  %v883_v7 = vld [vmem:[%s1069_s1 + $0x18] sm:$0xff]   ;;  %v885_v9 = vld [vmem:[%s1069_s1 + $0x28] sm:$0xff]  }
   0x3   :  { %783 = vmatpush3.bf16.msra.mxu0 %v136_v1  ;;  %v51_v4 = vld [vmem:[%s1070_s2] sm:$0x7]  ;;  %784 = vmatprep.mubr.msk.bf16.mxu0 %vm109_vm1, %v880_v2  ;;  %v886_v10 = vld [vmem:[%s1069_s1 + $0x30] sm:$0xff]   ;;  %v887_v11 = vld [vmem:[%s1069_s1 + $0x38] sm:$0xff]  }
   0x4   :  { %875 = vmatprep.subr.msk.bf16.mxu0 %vm300_vm2, %v51_v4  ;;  %v302_v5 = vsel %vm300_vm2, %v51_v4, 0  ;;  %v884_v8 = vld [vmem:[%s1069_s1 + $0x20] sm:$0xff]   ;;  %v889_v13 = vld [vmem:[%s1071_s0 + $0x8] sm:$0xff]   ;;  %v890_v14 = vld [vmem:[%s1071_s0 + $0x10] sm:$0xff]  }
   0x5   :  { %v888_v12 = vld [vmem:[%s1071_s0] sm:$0xff]   ;;  %v891_v15 = vld [vmem:[%s1071_s0 + $0x18] sm:$0xff]   ;;  %v893_v17 = vld [vmem:[%s1071_s0 + $0x28] sm:$0xff]  }
   0x6   :  { %785 = vmatmul.mubr.msk.bf16.vlgmr.msra.gmra.mrb[0].mxu0 %vm109_vm1, %v881_v3  ;;  %v892_v16 = vld [vmem:[%s1071_s0 + $0x20] sm:$0xff]   ;;  %v894_v18 = vld [vmem:[%s1071_s0 + $0x30] sm:$0xff]   ;;  %v895_v19 = vld [vmem:[%s1071_s0 + $0x38] sm:$0xff]  }
   0x7   :  { %801 = vmatpush3.bf16.msra.mxu0 %v302_v5  ;;  %788 = vmatprep.mubr.msk.bf16.mxu0 %vm109_vm1, %v882_v6  ;;  %v896_v20 = vld [vmem:[%s1072_s5] sm:$0xff]   ;;  %v897_v21 = vld [vmem:[%s1072_s5 + $0x8] sm:$0xff]  }
   0x8   :  { %818 = vmatprep.subr.bf16.mxu1 %v896_v20  ;;  %v732_v22 = vld [vmem:[%s1073_s4] ss:$0 sm:$0xff] }
   0x9   :  { %819 = vmatpush3.bf16.msra.mxu1 %v896_v20 }
   0xa   :  { %820 = vmatprep.subr.bf16.mxu1 %v897_v21 }
   0xd   :  { %821 = vmatpush3.bf16.msra.mxu1 %v897_v21 }
   0xe   :  { %789 = vmatmul.mubr.msk.bf16.gmra.mrb[4].mxu0 %vm109_vm1, %v883_v7 }
   0xf   :  { %792 = vmatprep.mubr.msk.bf16.mxu0 %vm109_vm1, %v884_v8 }
  0x16   :  { %793 = vmatmul.mubr.msk.bf16.gmra.mrb[8].mxu0 %vm109_vm1, %v885_v9 }
  0x17   :  { %796 = vmatprep.mubr.msk.bf16.mxu0 %vm109_vm1, %v886_v10 }
  0x1e   :  { %797 = vmatmul.mubr.msk.bf16.gmra.mrb[12].mxu0 %vm109_vm1, %v887_v11 }
  0x1f   :  { %802 = vmatprep.mubr.msk.bf16.mxu0 %vm275_vm3, %v888_v12 }
  0x26   :  { %803 = vmatmul.mubr.msk.bf16.vlgmr.msra.gmra.mrb[0].mxu0 %vm275_vm3, %v889_v13 }
  0x27   :  { %806 = vmatprep.mubr.msk.bf16.mxu0 %vm275_vm3, %v890_v14 }
  0x2e   :  { %807 = vmatmul.mubr.msk.bf16.gmra.mrb[4].mxu0 %vm275_vm3, %v891_v15  ;;  %v898_v15 = vmov 0.0  }
  0x2f   :  { %810 = vmatprep.mubr.msk.bf16.mxu0 %vm275_vm3, %v892_v16  ;;  %838 = vmatprep.subr.bf16.mxu1 %v898_v15  ;;  %v900_v16 = vmov 0  }
  0x30   :  { %879 = vset.pattern.permute.xlu0 %v900_v16 }
  0x36   :  { %811 = vmatmul.mubr.msk.bf16.gmra.mrb[8].mxu0 %vm275_vm3, %v893_v17  ;;  %v14_v17 = vstv %s1074_s8 }
  0x37   :  { %814 = vmatprep.mubr.msk.bf16.mxu0 %vm275_vm3, %v894_v18  ;;  %15 = vst [vmem:[#allocation2] sm:$0x1] %v14_v17 }
  0x3e   :  { %815 = vmatmul.mubr.msk.bf16.gmra.mrb[12].mxu0 %vm275_vm3, %v895_v19  ;;  %v618_v18 = vld [vmem:[#allocation2] sm:$0x1] }
  0x3f   :  { %621 = vperm.xlu0 %879, %v618_v18   ;;  %v733_v19 = vld [vmem:[%s1075_s6] ss:$0 sm:$0xff] }
  0xf9   :  { %v804_v23 = vpop.f32.mrb[0].mxu0 }
  0xfa   :  { %v410_v24 = vadd.f32 %v804_v23, %v732_v22  ;;  %v338_v25 = vpop.f32.mrb[1].mxu0 }
  0xfb   :  { %v408_v26 = vadd.f32 %v732_v22, %v338_v25  ;;  %v805_v27 = vpop.f32.mrb[2].mxu0 }
  0xfc   :  { %v411_v28 = vadd.f32 %v805_v27, %v732_v22  ;;  %v341_v29 = vpop.f32.mrb[3].mxu0  ;;  %v426_v31 = vmax.f32 %v410_v24, 0.0 }
  0xfd   :  { %v409_v30 = vadd.f32 %v732_v22, %v341_v29  ;;  %v424_v33 = vmax.f32 %v408_v26, 0.0 }
  0xfe   :  { %v427_v32 = vmax.f32 %v411_v28, 0.0 }
  0xff   :  { %v425_v34 = vmax.f32 %v409_v30, 0.0 }
 0x100   :  { %v441_v35 = vpack.c.bf16 %v427_v32, %v426_v31 }
 0x101   :  { %v808_v36 = vpop.f32.mrb[4].mxu0  ;;  %v440_v37 = vpack.c.bf16 %v425_v34, %v424_v33 }
 0x102   :  { %v414_v38 = vadd.f32 %v808_v36, %v732_v22  ;;  %v354_v39 = vpop.f32.mrb[5].mxu0 }
 0x103   :  { %v412_v40 = vadd.f32 %v732_v22, %v354_v39  ;;  %v809_v41 = vpop.f32.mrb[6].mxu0  ;;  %822 = vmatprep.mubr.msk.bf16.mxu1 %vm471_vm4, %v440_v37 }
 0x104   :  { %v415_v42 = vadd.f32 %v809_v41, %v732_v22  ;;  %v357_v43 = vpop.f32.mrb[7].mxu0  ;;  %823 = vmatmul.mubr.msk.bf16.vlgmr.msra.gmra.mrb[0].mxu1 %vm471_vm4, %v441_v35  ;;  %v430_v45 = vmax.f32 %v414_v38, 0.0 }
 0x105   :  { %v413_v44 = vadd.f32 %v732_v22, %v357_v43  ;;  %v428_v47 = vmax.f32 %v412_v40, 0.0 }
 0x106   :  { %v431_v46 = vmax.f32 %v415_v42, 0.0 }
 0x107   :  { %v429_v48 = vmax.f32 %v413_v44, 0.0 }
 0x108   :  { %v443_v49 = vpack.c.bf16 %v431_v46, %v430_v45 }
 0x109   :  { %v442_v50 = vpack.c.bf16 %v429_v48, %v428_v47  ;;  %v812_v51 = vpop.f32.mrb[8].mxu0 }
 0x10a   :  { %v418_v52 = vadd.f32 %v812_v51, %v732_v22  ;;  %v370_v53 = vpop.f32.mrb[9].mxu0 }
 0x10b   :  { %v416_v54 = vadd.f32 %v732_v22, %v370_v53  ;;  %v813_v55 = vpop.f32.mrb[10].mxu0  ;;  %826 = vmatprep.mubr.msk.bf16.mxu1 %vm471_vm4, %v442_v50 }
 0x10c   :  { %v419_v56 = vadd.f32 %v813_v55, %v732_v22  ;;  %v373_v57 = vpop.f32.mrb[11].mxu0  ;;  %827 = vmatmul.mubr.msk.bf16.gmra.mrb[4].mxu1 %vm471_vm4, %v443_v49  ;;  %v434_v59 = vmax.f32 %v418_v52, 0.0 }
 0x10d   :  { %v417_v58 = vadd.f32 %v732_v22, %v373_v57  ;;  %v432_v61 = vmax.f32 %v416_v54, 0.0 }
 0x10e   :  { %v435_v60 = vmax.f32 %v419_v56, 0.0 }
 0x10f   :  { %v433_v62 = vmax.f32 %v417_v58, 0.0 }
 0x110   :  { %v445_v63 = vpack.c.bf16 %v435_v60, %v434_v59 }
 0x111   :  { %v444_v0 = vpack.c.bf16 %v433_v62, %v432_v61  ;;  %v816_v1 = vpop.f32.mrb[12].mxu0 }
 0x112   :  { %v422_v2 = vadd.f32 %v816_v1, %v732_v22  ;;  %v386_v3 = vpop.f32.mrb[13].mxu0 }
 0x113   :  { %v420_v4 = vadd.f32 %v732_v22, %v386_v3  ;;  %v817_v5 = vpop.f32.mrb[14].mxu0  ;;  %830 = vmatprep.mubr.msk.bf16.mxu1 %vm471_vm4, %v444_v0 }
 0x114   :  { %v423_v6 = vadd.f32 %v817_v5, %v732_v22  ;;  %v389_v7 = vpop.f32.mrb[15].mxu0  ;;  %831 = vmatmul.mubr.msk.bf16.gmra.mrb[8].mxu1 %vm471_vm4, %v445_v63  ;;  %v438_v9 = vmax.f32 %v422_v2, 0.0 }
 0x115   :  { %v421_v8 = vadd.f32 %v732_v22, %v389_v7  ;;  %v436_v11 = vmax.f32 %v420_v4, 0.0 }
 0x116   :  { %v439_v10 = vmax.f32 %v423_v6, 0.0 }
 0x117   :  { %v437_v12 = vmax.f32 %v421_v8, 0.0 }
 0x118   :  { %v447_v13 = vpack.c.bf16 %v439_v10, %v438_v9 }
 0x119   :  { %v446_v14 = vpack.c.bf16 %v437_v12, %v436_v11 }
 0x11b   :  { %834 = vmatprep.mubr.msk.bf16.mxu1 %vm471_vm4, %v446_v14 }
 0x11c   :  { %835 = vmatmul.mubr.msk.bf16.gmra.mrb[12].mxu1 %vm471_vm4, %v447_v13 }
 0x11d   :  { %854 = vmatprep.mubr.msk.bf16.mxu1 %vm899_vm5, %v898_v15 }
 0x1d7   :  { %v824_v20 = vpop.f32.mrb[0].mxu1 }
 0x1d8   :  { %v539_v21 = vadd.f32 %v824_v20, %v733_v19  ;;  %v530_v22 = vpop.f32.mrb[1].mxu1 }
 0x1d9   :  { %v531_v23 = vadd.f32 %v733_v19, %v530_v22  ;;  %v825_v24 = vpop.f32.mrb[2].mxu1  ;;  %v624_v22 = vlaneseq }
 0x1da   :  { %v542_v25 = vadd.f32 %v825_v24, %v733_v19  ;;  %v533_v26 = vpop.f32.mrb[3].mxu1  ;;  %v595_v28 = vmax.f32 %v539_v21, 0.0  ;;  %v609_v21 = vld [vmem:[%s1076_s7] sm:$0x1] }
 0x1db   :  { %v534_v27 = vadd.f32 %v733_v19, %v533_v26  ;;  %v593_v30 = vmax.f32 %v531_v23, 0.0  ;;  %v625_v23 = vshrl.u32 %v624_v22, 7 }
 0x1dc   :  { %v596_v29 = vmax.f32 %v542_v25, 0.0  ;;  %v622_v25 = vpop.permute.xlu0 %621 }
 0x1dd   :  { %v594_v31 = vmax.f32 %v534_v27, 0.0  ;;  %v626_v24 = vsub.s32 0, %v625_v23 }
 0x1de   :  { %v611_v32 = vpack.c.bf16 %v596_v29, %v595_v28 }
 0x1df   :  { %v610_v33 = vpack.c.bf16 %v594_v31, %v593_v30  ;;  %v828_v34 = vpop.f32.mrb[4].mxu1  ;;  %v627_v26 = vrot.slane %v622_v25, %v626_v24 }
 0x1e0   :  { %v555_v35 = vadd.f32 %v828_v34, %v733_v19  ;;  %v546_v36 = vpop.f32.mrb[5].mxu1  ;;  %v635_v54 = vsel %vm471_vm4, %v611_v32, 0 }
 0x1e1   :  { %v547_v37 = vadd.f32 %v733_v19, %v546_v36  ;;  %v829_v38 = vpop.f32.mrb[6].mxu1  ;;  %v632_v39 = vsel %vm471_vm4, %v610_v33, 0 }
 0x1e2   :  { %v558_v40 = vadd.f32 %v829_v38, %v733_v19  ;;  %v549_v41 = vpop.f32.mrb[7].mxu1  ;;  %839 = vmatpush3.bf16.xpose.msra.mxu1 %v632_v39  ;;  %v599_v43 = vmax.f32 %v555_v35, 0.0 }
 0x1e3   :  { %v550_v42 = vadd.f32 %v733_v19, %v549_v41  ;;  %840 = vmatprep.subr.bf16.mxu1 %v898_v15  ;;  %v597_v45 = vmax.f32 %v547_v37, 0.0 }
 0x1e4   :  { %v600_v44 = vmax.f32 %v558_v40, 0.0 }
 0x1e5   :  { %v598_v46 = vmax.f32 %v550_v42, 0.0 }
 0x1e6   :  { %v613_v47 = vpack.c.bf16 %v600_v44, %v599_v43 }
 0x1e7   :  { %v612_v48 = vpack.c.bf16 %v598_v46, %v597_v45  ;;  %v832_v49 = vpop.f32.mrb[8].mxu1 }
 0x1e8   :  { %v571_v50 = vadd.f32 %v832_v49, %v733_v19  ;;  %v562_v51 = vpop.f32.mrb[9].mxu1  ;;  %v641_v16 = vsel %vm471_vm4, %v613_v47, 0 }
 0x1e9   :  { %v563_v52 = vadd.f32 %v733_v19, %v562_v51  ;;  %v833_v53 = vpop.f32.mrb[10].mxu1  ;;  %v638_v5 = vsel %vm471_vm4, %v612_v48, 0 }
 0x1ea   :  { %v574_v55 = vadd.f32 %v833_v53, %v733_v19  ;;  %v565_v56 = vpop.f32.mrb[11].mxu1  ;;  %841 = vmatpush3.bf16.xpose.msra.mxu1 %v635_v54  ;;  %v603_v58 = vmax.f32 %v571_v50, 0.0 }
 0x1eb   :  { %v566_v57 = vadd.f32 %v733_v19, %v565_v56  ;;  %842 = vmatprep.subr.bf16.mxu1 %v898_v15  ;;  %v601_v60 = vmax.f32 %v563_v52, 0.0 }
 0x1ec   :  { %v604_v59 = vmax.f32 %v574_v55, 0.0 }
 0x1ed   :  { %v602_v61 = vmax.f32 %v566_v57, 0.0 }
 0x1ee   :  { %v615_v62 = vpack.c.bf16 %v604_v59, %v603_v58 }
 0x1ef   :  { %v614_v63 = vpack.c.bf16 %v602_v61, %v601_v60  ;;  %v836_v0 = vpop.f32.mrb[12].mxu1 }
 0x1f0   :  { %v587_v1 = vadd.f32 %v836_v0, %v733_v19  ;;  %v578_v2 = vpop.f32.mrb[13].mxu1  ;;  %v647_v18 = vsel %vm471_vm4, %v615_v62, 0 }
 0x1f1   :  { %v579_v3 = vadd.f32 %v733_v19, %v578_v2  ;;  %v837_v4 = vpop.f32.mrb[14].mxu1  ;;  %v644_v17 = vsel %vm471_vm4, %v614_v63, 0 }
 0x1f2   :  { %v590_v6 = vadd.f32 %v837_v4, %v733_v19  ;;  %v581_v7 = vpop.f32.mrb[15].mxu1  ;;  %843 = vmatpush3.bf16.xpose.msra.mxu1 %v638_v5  ;;  %v607_v9 = vmax.f32 %v587_v1, 0.0 }
 0x1f3   :  { %v582_v8 = vadd.f32 %v733_v19, %v581_v7  ;;  %844 = vmatprep.subr.bf16.mxu1 %v898_v15  ;;  %v605_v11 = vmax.f32 %v579_v3, 0.0 }
 0x1f4   :  { %v608_v10 = vmax.f32 %v590_v6, 0.0 }
 0x1f5   :  { %v606_v12 = vmax.f32 %v582_v8, 0.0 }
 0x1f6   :  { %v617_v13 = vpack.c.bf16 %v608_v10, %v607_v9 }
 0x1f7   :  { %v616_v14 = vpack.c.bf16 %v606_v12, %v605_v11 }
 0x1f8   :  { %v653_v20 = vsel %vm471_vm4, %v617_v13, 0 }
 0x1f9   :  { %v650_v19 = vsel %vm471_vm4, %v616_v14, 0 }
 0x1fa   :  { %845 = vmatpush3.bf16.xpose.msra.mxu1 %v641_v16 }
 0x1fb   :  { %846 = vmatprep.subr.bf16.mxu1 %v898_v15 }
 0x202   :  { %847 = vmatpush3.bf16.xpose.msra.mxu1 %v644_v17 }
 0x203   :  { %848 = vmatprep.subr.bf16.mxu1 %v898_v15 }
 0x20a   :  { %849 = vmatpush3.bf16.xpose.msra.mxu1 %v647_v18 }
 0x20b   :  { %850 = vmatprep.subr.bf16.mxu1 %v898_v15 }
 0x212   :  { %851 = vmatpush3.bf16.xpose.msra.mxu1 %v650_v19 }
 0x213   :  { %852 = vmatprep.subr.bf16.mxu1 %v898_v15 }
 0x21a   :  { %853 = vmatpush3.bf16.xpose.msra.mxu1 %v653_v20 }
 0x221   :  { %855 = vmatmul.mubr.msk.bf16.vlgmr.msra.gmra.mrb[16].mxu1 %vm471_vm4, %v609_v21 }
 0x2f4   :  { %v689_v27 = vpop.f32.mrb[16].mxu1 }
 0x2f5   :  { %v690_v28 = vadd.f32 %v689_v27, %v627_v26  ;;  %v856_v29 = vpop.f32.mrb[17].mxu1 }
 0x2f6   :  { %v692_v30 = vpop.f32.mrb[18].mxu1 }
 0x2f7   :  { %695 = vst [vmem:[%s1077_s9] sm:$0x1] %v690_v28  ;;  %v857_v15 = vpop.f32.mrb[19].mxu1 }

</bundles_post_ra>
